<compile_context>
chip_gen: v5e
topology: v5e:2x2
jax: 0.10.0
libtpu: 0.0.40
codegen_flags: <defaults>
</compile_context>

<pallas_src>
import functools
import math

import jax
import jax.numpy as jnp
from jax.experimental import pallas as pl
from jax.experimental.pallas import tpu as pltpu


# ----------------------------------------------------------------------------
# Pallas kernel
# ----------------------------------------------------------------------------
def rmsnorm_kernel(x_ref, w_ref, o_ref, *, eps):
    # x_ref: (tm, D), w_ref: (1, D), o_ref: (tm, D)
    x = x_ref[...]
    xf = x.astype(jnp.float32)
    mean_sq = jnp.mean(xf * xf, axis=-1, keepdims=True)   # XLU cross-lane reduce
    inv_rms = jax.lax.rsqrt(mean_sq + eps)                 # EUP transcendental
    normed = (xf * inv_rms).astype(x.dtype)                # .type_as(x)
    # Natural promotion: bf16*bf16 -> bf16 (no f32 round trip on v6e/v7x),
    # bf16*f32 -> f32 (matches torch's weights * normed).
    o_ref[...] = (w_ref[...] * normed).astype(o_ref.dtype)


# ----------------------------------------------------------------------------
# Tiling policy
# ----------------------------------------------------------------------------
def _round_up(x, m):
    return ((x + m - 1) // m) * m


def _pick_row_tile(M, D, itemsize, tile_budget_bytes=4 << 20):
    """Fixed row-tile size (no divisor-of-M constraint; ragged handled by cdiv grid).

    * aligned to the packed-dtype sublane multiple (8 f32 / 16 bf16 / 32 int8),
    * ~4 MiB of input data per tile (good DMA efficiency on all generations),
    * capped so the grid has >= 2 steps (v7x megacore balance).
    """
    sub = {4: 8, 2: 16, 1: 32}.get(itemsize, 8)
    if M <= sub:
        return M  # full-extent block: always legal, single tiny tile
    rows = max(sub, (tile_budget_bytes // max(1, D * itemsize)) // sub * sub)
    half = _round_up(pl.cdiv(M, 2), sub)   # force at least 2 grid steps
    return min(rows, half)


# ----------------------------------------------------------------------------
# Wrapper
# ----------------------------------------------------------------------------
def pallas_rmsnorm(x, weights, eps=1e-5):
    """RMSNorm over the last axis of x. weights: (D,). Matches the torch module."""
    orig_shape = x.shape
    D = orig_shape[-1]
    M = math.prod(orig_shape[:-1]) if len(orig_shape) > 1 else 1

    x2 = x.reshape(M, D)
    w2 = weights.reshape(1, D)
    out_dtype = jnp.result_type(weights.dtype, x.dtype)

    itemsize = jnp.dtype(x.dtype).itemsize
    tm = _pick_row_tile(M, D, itemsize)
    grid = (pl.cdiv(M, tm),)

    cost = pl.CostEstimate(
        flops=4 * M * D,                 # square, reduce, scale, weight-mul
        transcendentals=M,               # one rsqrt per row
        bytes_accessed=(M * D * itemsize
                        + M * D * jnp.dtype(out_dtype).itemsize
                        + D * jnp.dtype(weights.dtype).itemsize),
    )

    out = pl.pallas_call(
        functools.partial(rmsnorm_kernel, eps=eps),
        out_shape=jax.ShapeDtypeStruct((M, D), out_dtype),
        grid=grid,
        in_specs=[
            pl.BlockSpec((tm, D), lambda i: (i, 0)),   # row slab of x
            pl.BlockSpec((1, D), lambda i: (0, 0)),    # weight, reused every step
        ],
        out_specs=pl.BlockSpec((tm, D), lambda i: (i, 0)),
        compiler_params=pltpu.CompilerParams(
            dimension_semantics=("parallel",),
            vmem_limit_bytes=48 << 20,   # headroom under v7x's 64 MiB physical
        ),
        cost_estimate=cost,
    )(x2, w2)

    return out.reshape(orig_shape)


# ----------------------------------------------------------------------------
# Reference + test
# ----------------------------------------------------------------------------
def ref_rmsnorm(x, w, eps=1e-5):
    xf = x.astype(jnp.float32)
    inv = jax.lax.rsqrt(jnp.mean(xf * xf, axis=-1, keepdims=True) + eps)
    return w * (xf * inv).astype(x.dtype)


if __name__ == "__main__":
    key = jax.random.PRNGKey(0)
    kx, kw, kx2, kx3 = jax.random.split(key, 4)

    # Small shape consistent with the module: (batch, seq, hidden).
    B, S, D = 2, 8, 32
    x = jax.random.normal(kx, (B, S, D), jnp.float32)
    weights = 1.0 + 0.01 * jax.random.normal(kw, (D,), jnp.float32)

    fwd = jax.jit(functools.partial(pallas_rmsnorm, eps=1e-5))
    out = fwd(x, weights)
    jax.block_until_ready(out)
    assert out.shape == (B, S, D)
    assert jnp.allclose(out, ref_rmsnorm(x, weights), atol=1e-5, rtol=1e-5)

    # Larger check: multi-step lane-dense grid path (D = 512).
    x_big = jax.random.normal(kx2, (4, 1024, 512), jnp.float32)
    w_big = jnp.ones((512,), jnp.float32)
    out_big = jax.block_until_ready(pallas_rmsnorm(x_big, w_big))
    assert jnp.allclose(out_big, ref_rmsnorm(x_big, w_big), atol=1e-5, rtol=1e-5)

    # Ragged-row check (M not a multiple of the tile) + bf16 input path.
    x_rag = jax.random.normal(kx3, (3, 100, 128), jnp.bfloat16)
    w_rag = 1.0 + 0.01 * jax.random.normal(kw, (128,), jnp.float32)
    out_rag = jax.block_until_ready(pallas_rmsnorm(x_rag, w_rag))
    assert out_rag.dtype == jnp.float32
    assert jnp.allclose(out_rag, ref_rmsnorm(x_rag, w_rag), atol=1e-2, rtol=1e-2)

    print("KERNEL_OK")
</pallas_src>

<mosaic_0001>
module attributes {stable_mosaic.version = 11 : i64} {
  func.func @rmsnorm_kernel(%arg0: i32, %arg1: memref<8x32xf32, #tpu.memory_space<vmem>>, %arg2: memref<1x32xf32, #tpu.memory_space<vmem>>, %arg3: memref<8x32xf32, #tpu.memory_space<vmem>>) attributes {dimension_semantics = [#tpu.dimension_semantics<parallel>], iteration_bounds = array<i64: 2>, scalar_prefetch = 0 : i64, scratch_operands = 0 : i64, tpu.core_type = #tpu.core_type<tc>, window_params = [{transform_indices = @transform_0, window_bounds = array<i64: 8, 32>}, {pipeline_mode = #tpu.pipeline_mode<synchronous>, transform_indices = @transform_1, window_bounds = array<i64: 1, 32>}, {transform_indices = @transform_2, window_bounds = array<i64: 8, 32>}]} {
    %c0 = arith.constant 0 : index
    %c0_0 = arith.constant 0 : index
    %0 = vector.load %arg1[%c0, %c0_0] : memref<8x32xf32, #tpu.memory_space<vmem>>, vector<8x32xf32>
    %1 = arith.mulf %0, %0 : vector<8x32xf32>
    %cst = arith.constant dense<0.000000e+00> : vector<8xf32>
    %2 = vector.multi_reduction <add>, %1, %cst [1] : vector<8x32xf32> to vector<8xf32>
    %3 = vector.shape_cast %2 : vector<8xf32> to vector<8x1xf32>
    %cst_1 = arith.constant 3.200000e+01 : f32
    %4 = vector.broadcast %cst_1 : f32 to vector<8x1xf32>
    %5 = arith.divf %3, %4 : vector<8x1xf32>
    %cst_2 = arith.constant 9.99999974E-6 : f32
    %6 = vector.broadcast %cst_2 : f32 to vector<8x1xf32>
    %7 = arith.addf %5, %6 : vector<8x1xf32>
    %8 = math.rsqrt %7 : vector<8x1xf32>
    %9 = vector.broadcast %8 : vector<8x1xf32> to vector<8x32xf32>
    %10 = arith.mulf %0, %9 : vector<8x32xf32>
    %c0_3 = arith.constant 0 : index
    %c0_4 = arith.constant 0 : index
    %11 = vector.load %arg2[%c0_3, %c0_4] : memref<1x32xf32, #tpu.memory_space<vmem>>, vector<1x32xf32>
    %12 = vector.broadcast %11 : vector<1x32xf32> to vector<8x32xf32>
    %13 = arith.mulf %12, %10 : vector<8x32xf32>
    %c0_5 = arith.constant 0 : index
    %c0_6 = arith.constant 0 : index
    %14 = vector.load %arg3[%c0_5, %c0_6] : memref<8x32xf32, #tpu.memory_space<vmem>>, vector<8x32xf32>
    tpu.vector_store %arg3[%c0_5, %c0_6], %13 {strides = array<i32>} : memref<8x32xf32, #tpu.memory_space<vmem>>, vector<8x32xf32>,
    return
  }
  func.func @transform_0(%arg0: i32) -> (i32, i32) {
    %c0_i32 = arith.constant 0 : i32
    %c0_i32_0 = arith.constant 0 : i32
    return %arg0, %c0_i32 : i32, i32
  }
  func.func @transform_1(%arg0: i32) -> (i32, i32) {
    %c0_i32 = arith.constant 0 : i32
    %c0_i32_0 = arith.constant 0 : i32
    %c0_i32_1 = arith.constant 0 : i32
    return %c0_i32, %c0_i32_0 : i32, i32
  }
  func.func @transform_2(%arg0: i32) -> (i32, i32) {
    %c0_i32 = arith.constant 0 : i32
    %c0_i32_0 = arith.constant 0 : i32
    return %arg0, %c0_i32 : i32, i32
  }
}

</mosaic_0001>

<bundles_post_ra>
// kernel: pallas_rmsnorm.1
= control target key start
LH: loop header
LB: loop body
LE: loop exit
PB: predicated region body
PF: predicated region fallthrough
CT: control target
= control target key end

     0   :  { %7 = vsyncpa [#allocation3], 0  ;;  %s593_s0 = inlined_call_operand.hbm [shape: f32[16,32], index: 0, kind: input, shape index: {}]   ;;  %s594_s1 = inlined_call_operand.vmem [shape: f32[1,32], index: 1, kind: input, shape index: {}]   ;;  %s595_s2 = inlined_call_operand.hbm [shape: f32[16,32], index: 2, kind: output, shape index: {}]  }
   0x1   :  { %9 = vsyncpa [#allocation3 + $0x1], 0 }
   0x2   :  { %10 = vsyncpa [#allocation4], 0 }
   0x3   :  { %12 = vsyncpa [#allocation4 + $0x1], 0  ;;  %s457_s9 = smov 0   ;;  %s459_s10 = smov 0  }
   0x4   :  { %s461_s11 = smov 0   ;;  %s463_s12 = smov 0  }
   0x5 LB: > { %s478_s13 = sadd.s32 4294967295, %s439_s12   ;;  %s279_s14 = sadd.s32 4294967294, %s439_s12   ;;  %s439_s12 = sphi %s463_s12, %s605_s12   ;;  %s435_s11 = sphi %s461_s11, %s604_s11   ;;  %s431_s10 = sphi %s459_s10, %s603_s10   ;;  %s427_s9 = sphi %s457_s9, %s602_s9  }
   0x6   : > { %s482_s15 = sadd.s32 1, %s439_s12   ;;  %s25_s16 = sadd.s32 1, %s435_s11 }
   0x7   : > { %s22_s17 = ssub.s32 %s439_s12, %s482_s15  ;;  %p32_p0 = scmp.ne.s32.totalorder %s435_s11, %s431_s10 }
   0x8   : > { %p23_p1 = scmp.eq.s32.totalorder %s22_s17, 0  ;;  %p33_p2 = scmp.eq.s32.totalorder %s439_s12, 0 }
   0x9   : > { %p38_p3 = scmp.ne.s32.totalorder %s431_s10, %s427_s9  ;;  %p39_p4 = scmp.eq.s32.totalorder %s478_s13, 0 }
   0xa   : > { %s494_s18 = scalar_select %p23_p1, %s435_s11, %s25_s16  }
   0xb   : > { %p496_p5 = por %p33_p2, %p32_p0  ;;  %p500_p6 = por %p39_p4, %p38_p3 }
   0xc   : > { %p83_p7 = scmp.eq.s32.totalorder %s478_s13, 1  ;;  %p89_p8 = scmp.eq.s32.totalorder %s279_s14, 1 }
   0xd   : > { %p303_p10 = scmp.lt.s32.totalorder %s439_s12, 2  ;;  %s112_s23 = sand.u32 1, %s435_s11  }
   0xe   : > { %p507_p11 = por %p83_p7, %p32_p0  ;;  %p511_p12 = por %p89_p8, %p38_p3 }
   0xf   : > { %s283_s24 = sshll.u32 %s439_s12, 3  ;;  %s282_s25 = sshll.u32 %s112_s23, 3 }
  0x10   : > { %s120_s28 = scalar_lea.hbm %s593_s0, %s283_s24  ;;  %s116_s30 = scalar_lea.vmem [#allocation2], %s282_s25 }
  0x11   : > { %s122_s29 = sshll.u32 %s120_s28, 4  ;;  %s124_s3 = sshll.u32 %s116_s30, 4  ;;  %s123_s29 = int_to_ptr.hbm [resolvable:$true] %s122_s29  ;;  %s125_s3 = int_to_ptr.vmem [resolvable:$true] %s124_s3 }
  0x12   : > { %p522_p13 = pnand %p303_p10, %p496_p5  ;;  %p284_p0 = scmp.ge.s32.totalorder %s439_s12, 1 }
  0x13   : > { %p129_p1 = scmp.lt.s32.totalorder %s439_s12, 3  ;;  %s113_s5 = scalar_lea.sflag [#allocation3], %s112_s23 }
  0x14   : > { %s343_s6 = sshra.s32 %s123_s29, 4  ;;  %p347_p3 = pneg %p522_p13  ;;  %s344_s6 = int_to_ptr.hbm [resolvable:$true] %s343_s6 }
  0x15   : > { %s345_s7 = scalar_lea.hbm %s344_s6, 8  ;;  %s350_s16 = scalar_lea.hbm %s593_s0, 16 }
  0x16   : > { %p346_p2 = scmp.ne.s32.totalorder %s344_s6, %s345_s7  ;;  %p351_p5 = scmp.lt.s32.totalorder %s344_s6, %s593_s0 }
  0x17   : > { %p352_p8 = scmp.lt.s32.totalorder %s350_s16, %s345_s7 }
  0x18   : > { %p348_p4 = pnand %p347_p3, %p346_p2 }
  0x19   : > { %p353_p10 = por %p352_p8, %p351_p5 }
  0x1a   : > { %p349_p7 = pneg %p348_p4 }
  0x1c   : > { %p354_p9 = pnand %p353_p10, %p349_p7 }
  0x1e   : > { %357 = shalt.err (!%p354_p9)
}
  0x1f   : > { %298 = dma.hbm_to_vmem [thread:$0]  (!%p522_p13), %s123_s29, 128, %s125_s3, %s113_s5  }
  0x20   : > { %p130_p2 = pnand %p284_p0, %p129_p1 }
  0x21   : > { %s543_s23 = sand.u32 (!%p130_p2), 1, %s431_s10  }
  0x22   : > { %133 = sbr.rel (%p130_p2) target bundleno = 189 (0xbd), region = 28  ;;  %s285_s24 = sshll.u32 (!%p130_p2), %s543_s23, 3 }
  0x23   : > { %s136_s25 = scalar_lea.sflag (!%p130_p2), [#allocation3], %s543_s23  ;;  %s139_s26 = scalar_lea.vmem (!%p130_p2), [#allocation2], %s285_s24 }
  0x27   : > { %418 = dma.done.wait (%p500_p6), %s136_s25, 128  }
  0x28   : > { %420 = vsyncadd (%p500_p6), %s136_s25, 4294967168  ;;  %v161_v0 = vld [vmem:[%s139_s26] sm:$0xff]  ;;  %vm163_vm0 = vcmask 261120   ;;  %v441_v3 = vmov 32.0   ;;  %s288_s20 = sshll.u32 %s478_s13, 3  ;;  %s160_s4 = scalar_lea.vmem [#allocation5], %s285_s24 }
  0x29   : > { %v162_v1 = vmul.f32 %v161_v0, %v161_v0  ;;  %339 = vrcp.f32 %v441_v3  ;;  %s204_s29 = scalar_lea.hbm %s595_s2, %s288_s20  ;;  %v338_v19 = vld [vmem:[%s594_s1] ss:$0 sm:$0xff]  ;;  %s206_s5 = sshll.u32 %s160_s4, 4  ;;  %s207_s5 = int_to_ptr.vmem [resolvable:$true] %s206_s5 }
  0x2a   : > { %s208_s13 = sshll.u32 %s204_s29, 4  ;;  %s194_s6 = scalar_lea.sflag [#allocation4], %s543_s23  ;;  %s209_s13 = int_to_ptr.hbm [resolvable:$true] %s208_s13 }
  0x2b   : > { %v164_v2 = vsel %vm163_vm0, %v162_v1, 0.0  ;;  %s387_s7 = sshra.s32 %s209_s13, 4  ;;  %s393_s17 = scalar_lea.hbm %s595_s2, 16  ;;  %s388_s7 = int_to_ptr.hbm [resolvable:$true] %s387_s7 }
  0x2c   : > { %165 = vadd.xlane.f32.xlu0 %v164_v2  ;;  %s389_s8 = scalar_lea.hbm %s388_s7, 8  ;;  %p394_p0 = scmp.lt.s32.totalorder %s388_s7, %s595_s2 }
  0x2d   : > { %p390_p6 = scmp.ne.s32.totalorder %s388_s7, %s389_s8  ;;  %p395_p1 = scmp.lt.s32.totalorder %s393_s17, %s389_s8 }
  0x2f   : > { %v340_v4 = vpop.eup %339  ;;  %p391_p9 = pnand %p390_p6, %p507_p11  ;;  %p396_p3 = por %p395_p1, %p394_p0 }
  0x30   : > { %v168_v5 = vmul.f32 32.0, %v340_v4  ;;  %vm172_vm1 = vweird.f32 %v340_v4 }
  0x31   : > { %p392_p13 = pneg %p391_p9 }
  0x32   : > { %v169_v6 = vsub.f32 1.0, %v168_v5 }
  0x33   : > { %p397_p4 = pnand %p396_p3, %p392_p13 }
  0x34   : > { %v170_v7 = vmul.f32 %v340_v4, %v169_v6 }
  0x36   : > { %v171_v8 = vadd.f32 %v340_v4, %v170_v7 }
  0x38   : > { %v173_v9 = vsel %vm172_vm1, %v340_v4, %v171_v8 }
  0x9f   : > { %v166_v10 = vpop.xlane.xlu0 %165 }
  0xa0   : > { %v174_v11 = vmul.f32 %v173_v9, %v166_v10 }
  0xa2   : > { %v175_v12 = vadd.f32 1e-05, %v174_v11 }
  0xa4   : > { %341 = vrsqrt.f32 %v175_v12  ;;  %vm182_vm3 = vweird.f32 %v175_v12 }
  0xaa   : > { %v342_v13 = vpop.eup %341 }
  0xab   : > { %v177_v14 = vmul.f32 %v342_v13, %v175_v12  ;;  %vm183_vm2 = vweird.f32 %v342_v13 }
  0xac   : > { %vm184_vm4 = vmor %vm182_vm3, %vm183_vm2 }
  0xad   : > { %v178_v15 = vmul.f32 %v342_v13, %v177_v14 }
  0xaf   : > { %v179_v16 = vmul.f32 0.5, %v178_v15 }
  0xb1   : > { %v180_v17 = vsub.f32 1.5, %v179_v16 }
  0xb3   : > { %v181_v18 = vmul.f32 %v342_v13, %v180_v17 }
  0xb5   : > { %v185_v20 = vsel %vm184_vm4, %v342_v13, %v181_v18 }
  0xb6   : > { %v186_v21 = vmul.f32 %v185_v20, %v161_v0 }
  0xb8   : > { %v191_v22 = vmul.f32 %v338_v19, %v186_v21 }
  0xba   : > { %192 = vst.msk [vmem:[%s160_s4] sm:$0xff] %vm163_vm0, %v191_v22 }
  0xbb   : > { %400 = shalt.err (!%p397_p4)
}
  0xbc   : > { %293 = dma.vmem_to_hbm [thread:$0]  (%p507_p11), %s207_s5, 128, %s209_s13, %s194_s6  }
  0xbd PF: > { %s220_s23 = sand.u32 1, %s427_s9   ;;  %p601_p7 = scmp.ge.s32.totalorder %s439_s12, 2 }
  0xbe   : > { %s221_s25 = scalar_lea.sflag [#allocation4], %s220_s23 }
  0xbf   : > { %p300_p5 = pnand %p601_p7, %p511_p12 }
  0xc1   : > { %p301_p8 = pneg %p300_p5 }
  0xc3   : > { %422 = dma.done.wait (%p301_p8), %s221_s25, 128  }
  0xc4   : > { %424 = vsyncadd (%p301_p8), %s221_s25, 4294967168  ;;  %p15_p10 = scmp.ge.s32.totalorder %s482_s15, 4   ;;  %s602_s9 = smov %s431_s10 }
  0xc5   : > { %s603_s10 = smov %s435_s11  ;;  %s604_s11 = smov %s494_s18 }
  0xc6   : > { %s605_s12 = smov %s482_s15  ;;  %17 = sbr.rel (!%p15_p10) target bundleno = 5 (0x5), region = 73 }
  0xcb   :  { %227 = vsyncpa [#allocation3], 1 }
  0xcc   :  { %229 = vsyncpa [#allocation3 + $0x1], 1 }
  0xcd   :  { %230 = vsyncpa [#allocation4], 1 }
  0xce   :  { %232 = vsyncpa [#allocation4 + $0x1], 1 }

</bundles_post_ra>
